<compile_context>
chip_gen: v6e
topology: v6e:2x2x1
jax: 0.10.0
libtpu: 0.0.40
codegen_flags: <defaults>
</compile_context>

<pallas_src>
import jax
import jax.numpy as jnp
from jax import lax
from jax.experimental import pallas as pl
from jax.experimental.pallas import tpu as pltpu


def _round_up(x, m):
    return ((x + m - 1) // m) * m


def _embed_kernel(ids_ref, table_ref, out_ref, acc_ref):
    """Grid step (i, k): batch tile i  x  vocab tile k.

    ids_ref:   (TM, S)  int32     token ids of this batch tile
    table_ref: (TV, D)  bfloat16  vocab tile of the embedding table
    out_ref:   (TM, D)  float32   mean-pooled embeddings (written at last k)
    acc_ref:   (TM, D)  float32   VMEM accumulator (resident across k)
    """
    k = pl.program_id(1)

    @pl.when(k == 0)
    def _init():
        acc_ref[...] = jnp.zeros_like(acc_ref)

    TM, S = ids_ref.shape
    TV = table_ref.shape[0]

    # Vocab ids covered by this tile, on the lane axis.  Hoisted once per grid
    # step; the S compares below all reuse it.
    viota = lax.broadcasted_iota(jnp.int32, (TM, TV), 1) + k * TV

    # counts[m, v] = number of tokens in row m equal to vocab id v.
    # S is small & static -> unrolled VPU compares on lane-dense (TM, TV) tiles.
    counts = jnp.zeros((TM, TV), dtype=jnp.float32)
    for s in range(S):
        counts += (ids_ref[:, pl.ds(s, 1)] == viota).astype(jnp.float32)

    # Gather + sum fused into one MXU matmul: bf16 operands, f32 accumulate.
    # (counts are small integers, exactly representable in bf16.)
    acc_ref[...] += jnp.dot(
        counts.astype(table_ref.dtype),
        table_ref[...],
        preferred_element_type=jnp.float32,
    )

    @pl.when(k == pl.num_programs(1) - 1)
    def _finalize():
        # Mean over the sequence: one epilogue scale, no reduction needed.
        # TODO(synk): if variable-length (padded) sequences are ever used,
        # pass true lengths and divide by them instead of the full S.
        out_ref[...] = (acc_ref[...] * (1.0 / S)).astype(out_ref.dtype)


def embedder_forward(token_ids, table):
    """token_ids: (B, S) int token ids, table: (V, D) float32 -> (B, D) float32."""
    B, S = token_ids.shape
    V, D = table.shape

    # Match gather semantics of table[token_ids] for out-of-range ids (clamp).
    ids = jnp.clip(token_ids.astype(jnp.int32), 0, V - 1)

    # Batch tile: >= 8 sublanes so output stores are unmasked; capped at 128.
    TM = min(128, _round_up(B, 8))
    B_pad = _round_up(B, TM)

    # Vocab tile: lane-dense (multiple of 128); switch to 512-row tiles once
    # the table is big so one (TV, D) slab always fits VMEM (v5e/v6e/v7x).
    Vp = _round_up(V, 128)
    TV = Vp if Vp <= 1024 else 512
    Vp = _round_up(Vp, TV)

    ids_p = jnp.pad(ids, ((0, B_pad - B), (0, 0)))
    # bf16 MXU operand; padded vocab rows are zero so they never contribute.
    table_p = jnp.pad(table.astype(jnp.bfloat16), ((0, Vp - V), (0, 0)))

    grid = (B_pad // TM, Vp // TV)

    out = pl.pallas_call(
        _embed_kernel,
        out_shape=jax.ShapeDtypeStruct((B_pad, D), jnp.float32),
        grid_spec=pltpu.PrefetchScalarGridSpec(
            num_scalar_prefetch=0,
            grid=grid,
            in_specs=[
                pl.BlockSpec((TM, S), lambda i, k: (i, 0)),   # batch tile of ids
                pl.BlockSpec((TV, D), lambda i, k: (k, 0)),   # vocab tile of table
            ],
            out_specs=pl.BlockSpec((TM, D), lambda i, k: (i, 0)),
            scratch_shapes=[pltpu.VMEM((TM, D), jnp.float32)],
        ),
        compiler_params=pltpu.CompilerParams(
            dimension_semantics=("parallel", "arbitrary"),
        ),
        cost_estimate=pl.CostEstimate(
            flops=2 * B_pad * Vp * D,
            transcendentals=0,
            bytes_accessed=(B_pad // TM) * Vp * D * 2 + B_pad * S * 4 + B_pad * D * 4,
        ),
    )(ids_p, table_p)

    return out[:B]


if __name__ == "__main__":
    # Small, deterministic setup consistent with the module's forward:
    # a batch of token-id sequences -> one embedding per sequence.
    B, S, V, D = 2, 8, 32, 128

    key = jax.random.PRNGKey(0)
    k_tab, k_ids = jax.random.split(key)

    # TODO(synk): the original module runs an external TF-Hub ELMo graph via
    # session.run; it is replaced by this deterministic synthetic embedding
    # table (same output shape/dtype semantics: one float32 vector per row).
    table = jax.random.normal(k_tab, (V, D), dtype=jnp.float32)
    token_ids = jax.random.randint(k_ids, (B, S), minval=0, maxval=V, dtype=jnp.int32)

    out = jax.block_until_ready(embedder_forward(token_ids, table))
    assert out.shape == (B, D) and out.dtype == jnp.float32

    # Exact-math reference using the same bf16 table operand the kernel feeds the MXU.
    ref_bf16 = jnp.mean(table.astype(jnp.bfloat16).astype(jnp.float32)[token_ids], axis=1)
    assert jnp.allclose(out, ref_bf16, atol=1e-5, rtol=1e-5)

    # Sanity vs the full-f32 reference (only bf16 table rounding differs).
    ref_f32 = jnp.mean(table[token_ids], axis=1)
    assert jnp.allclose(out, ref_f32, atol=5e-2, rtol=5e-2)

    print("KERNEL_OK")
</pallas_src>

<mosaic_0001>
module attributes {stable_mosaic.version = 11 : i64} {
  func.func @_embed_kernel(%arg0: i32, %arg1: i32, %arg2: memref<8x8xi32, #tpu.memory_space<vmem>>, %arg3: memref<128x128xbf16, #tpu.memory_space<vmem>>, %arg4: memref<8x128xf32, #tpu.memory_space<vmem>>, %arg5: memref<8x128xf32, #tpu.memory_space<vmem>>) attributes {dimension_semantics = [#tpu.dimension_semantics<parallel>, #tpu.dimension_semantics<arbitrary>], iteration_bounds = array<i64: 1, 1>, scalar_prefetch = 0 : i64, scratch_operands = 1 : i64, tpu.core_type = #tpu.core_type<tc>, window_params = [{transform_indices = @transform_0, window_bounds = array<i64: 8, 8>}, {transform_indices = @transform_1, window_bounds = array<i64: 128, 128>}, {transform_indices = @transform_2, window_bounds = array<i64: 8, 128>}]} {
    %c0_i32 = arith.constant 0 : i32
    %0 = arith.cmpi eq, %arg1, %c0_i32 : i32
    %1 = arith.extui %0 : i1 to i32
    %c0_i32_0 = arith.constant 0 : i32
    %2 = arith.cmpi ne, %1, %c0_i32_0 : i32
    scf.if %2 {
      %cst_18 = arith.constant 0.000000e+00 : f32
      %65 = vector.broadcast %cst_18 : f32 to vector<8x128xf32>
      %c0_19 = arith.constant 0 : index
      %c0_20 = arith.constant 0 : index
      %66 = vector.load %arg5[%c0_19, %c0_20] : memref<8x128xf32, #tpu.memory_space<vmem>>, vector<8x128xf32>
      tpu.vector_store %arg5[%c0_19, %c0_20], %65 {strides = array<i32>} : memref<8x128xf32, #tpu.memory_space<vmem>>, vector<8x128xf32>,
    } else {
    }
    %3 = tpu.iota {dimensions = array<i32: 1>} : vector<8x128xi32>
    %c128_i32 = arith.constant 128 : i32
    %4 = arith.muli %arg1, %c128_i32 : i32
    %5 = vector.broadcast %4 : i32 to vector<8x128xi32>
    %6 = arith.addi %3, %5 : vector<8x128xi32>
    %cst = arith.constant 0.000000e+00 : f32
    %7 = vector.broadcast %cst : f32 to vector<8x128xf32>
    %c0 = arith.constant 0 : index
    %c0_1 = arith.constant 0 : index
    %8 = vector.load %arg2[%c0, %c0_1] : memref<8x8xi32, #tpu.memory_space<vmem>>, vector<8x1xi32>
    %9 = vector.broadcast %8 : vector<8x1xi32> to vector<8x128xi32>
    %10 = arith.cmpi eq, %9, %6 : vector<8x128xi32>
    %11 = arith.extui %10 : vector<8x128xi1> to vector<8x128xi32>
    %12 = arith.sitofp %11 : vector<8x128xi32> to vector<8x128xf32>
    %13 = arith.addf %7, %12 : vector<8x128xf32>
    %c0_2 = arith.constant 0 : index
    %c1 = arith.constant 1 : index
    %14 = vector.load %arg2[%c0_2, %c1] : memref<8x8xi32, #tpu.memory_space<vmem>>, vector<8x1xi32>
    %15 = vector.broadcast %14 : vector<8x1xi32> to vector<8x128xi32>
    %16 = arith.cmpi eq, %15, %6 : vector<8x128xi32>
    %17 = arith.extui %16 : vector<8x128xi1> to vector<8x128xi32>
    %18 = arith.sitofp %17 : vector<8x128xi32> to vector<8x128xf32>
    %19 = arith.addf %13, %18 : vector<8x128xf32>
    %c0_3 = arith.constant 0 : index
    %c2 = arith.constant 2 : index
    %20 = vector.load %arg2[%c0_3, %c2] : memref<8x8xi32, #tpu.memory_space<vmem>>, vector<8x1xi32>
    %21 = vector.broadcast %20 : vector<8x1xi32> to vector<8x128xi32>
    %22 = arith.cmpi eq, %21, %6 : vector<8x128xi32>
    %23 = arith.extui %22 : vector<8x128xi1> to vector<8x128xi32>
    %24 = arith.sitofp %23 : vector<8x128xi32> to vector<8x128xf32>
    %25 = arith.addf %19, %24 : vector<8x128xf32>
    %c0_4 = arith.constant 0 : index
    %c3 = arith.constant 3 : index
    %26 = vector.load %arg2[%c0_4, %c3] : memref<8x8xi32, #tpu.memory_space<vmem>>, vector<8x1xi32>
    %27 = vector.broadcast %26 : vector<8x1xi32> to vector<8x128xi32>
    %28 = arith.cmpi eq, %27, %6 : vector<8x128xi32>
    %29 = arith.extui %28 : vector<8x128xi1> to vector<8x128xi32>
    %30 = arith.sitofp %29 : vector<8x128xi32> to vector<8x128xf32>
    %31 = arith.addf %25, %30 : vector<8x128xf32>
    %c0_5 = arith.constant 0 : index
    %c4 = arith.constant 4 : index
    %32 = vector.load %arg2[%c0_5, %c4] : memref<8x8xi32, #tpu.memory_space<vmem>>, vector<8x1xi32>
    %33 = vector.broadcast %32 : vector<8x1xi32> to vector<8x128xi32>
    %34 = arith.cmpi eq, %33, %6 : vector<8x128xi32>
    %35 = arith.extui %34 : vector<8x128xi1> to vector<8x128xi32>
    %36 = arith.sitofp %35 : vector<8x128xi32> to vector<8x128xf32>
    %37 = arith.addf %31, %36 : vector<8x128xf32>
    %c0_6 = arith.constant 0 : index
    %c5 = arith.constant 5 : index
    %38 = vector.load %arg2[%c0_6, %c5] : memref<8x8xi32, #tpu.memory_space<vmem>>, vector<8x1xi32>
    %39 = vector.broadcast %38 : vector<8x1xi32> to vector<8x128xi32>
    %40 = arith.cmpi eq, %39, %6 : vector<8x128xi32>
    %41 = arith.extui %40 : vector<8x128xi1> to vector<8x128xi32>
    %42 = arith.sitofp %41 : vector<8x128xi32> to vector<8x128xf32>
    %43 = arith.addf %37, %42 : vector<8x128xf32>
    %c0_7 = arith.constant 0 : index
    %c6 = arith.constant 6 : index
    %44 = vector.load %arg2[%c0_7, %c6] : memref<8x8xi32, #tpu.memory_space<vmem>>, vector<8x1xi32>
    %45 = vector.broadcast %44 : vector<8x1xi32> to vector<8x128xi32>
    %46 = arith.cmpi eq, %45, %6 : vector<8x128xi32>
    %47 = arith.extui %46 : vector<8x128xi1> to vector<8x128xi32>
    %48 = arith.sitofp %47 : vector<8x128xi32> to vector<8x128xf32>
    %49 = arith.addf %43, %48 : vector<8x128xf32>
    %c0_8 = arith.constant 0 : index
    %c7 = arith.constant 7 : index
    %50 = vector.load %arg2[%c0_8, %c7] : memref<8x8xi32, #tpu.memory_space<vmem>>, vector<8x1xi32>
    %51 = vector.broadcast %50 : vector<8x1xi32> to vector<8x128xi32>
    %52 = arith.cmpi eq, %51, %6 : vector<8x128xi32>
    %53 = arith.extui %52 : vector<8x128xi1> to vector<8x128xi32>
    %54 = arith.sitofp %53 : vector<8x128xi32> to vector<8x128xf32>
    %55 = arith.addf %49, %54 : vector<8x128xf32>
    %c0_9 = arith.constant 0 : index
    %c0_10 = arith.constant 0 : index
    %56 = vector.load %arg5[%c0_9, %c0_10] : memref<8x128xf32, #tpu.memory_space<vmem>>, vector<8x128xf32>
    %57 = arith.truncf %55 : vector<8x128xf32> to vector<8x128xbf16>
    %c0_11 = arith.constant 0 : index
    %c0_12 = arith.constant 0 : index
    %58 = vector.load %arg3[%c0_11, %c0_12] : memref<128x128xbf16, #tpu.memory_space<vmem>>, vector<128x128xbf16>
    %cst_13 = arith.constant dense<0.000000e+00> : vector<8x128xf32>
    %59 = tpu.matmul %57, %58, %cst_13 {dimension_numbers = #tpu.dot_dimension_numbers<[1], [0], [0], [1], [0, 0, 1, 1], [], []>} : vector<8x128xbf16>, vector<128x128xbf16>, vector<8x128xf32> -> vector<8x128xf32>
    %60 = arith.addf %56, %59 : vector<8x128xf32>
    %c0_14 = arith.constant 0 : index
    %c0_15 = arith.constant 0 : index
    %61 = vector.load %arg5[%c0_14, %c0_15] : memref<8x128xf32, #tpu.memory_space<vmem>>, vector<8x128xf32>
    tpu.vector_store %arg5[%c0_14, %c0_15], %60 {strides = array<i32>} : memref<8x128xf32, #tpu.memory_space<vmem>>, vector<8x128xf32>,
    %c0_i32_16 = arith.constant 0 : i32
    %62 = arith.cmpi eq, %arg1, %c0_i32_16 : i32
    %63 = arith.extui %62 : i1 to i32
    %c0_i32_17 = arith.constant 0 : i32
    %64 = arith.cmpi ne, %63, %c0_i32_17 : i32
    scf.if %64 {
      %c0_18 = arith.constant 0 : index
      %c0_19 = arith.constant 0 : index
      %65 = vector.load %arg5[%c0_18, %c0_19] : memref<8x128xf32, #tpu.memory_space<vmem>>, vector<8x128xf32>
      %cst_20 = arith.constant 1.250000e-01 : f32
      %66 = vector.broadcast %cst_20 : f32 to vector<8x128xf32>
      %67 = arith.mulf %65, %66 : vector<8x128xf32>
      %c0_21 = arith.constant 0 : index
      %c0_22 = arith.constant 0 : index
      %68 = vector.load %arg4[%c0_21, %c0_22] : memref<8x128xf32, #tpu.memory_space<vmem>>, vector<8x128xf32>
      tpu.vector_store %arg4[%c0_21, %c0_22], %67 {strides = array<i32>} : memref<8x128xf32, #tpu.memory_space<vmem>>, vector<8x128xf32>,
    } else {
    }
    return
  }
  func.func @transform_0(%arg0: i32, %arg1: i32) -> (i32, i32) {
    %c0_i32 = arith.constant 0 : i32
    %c0_i32_0 = arith.constant 0 : i32
    return %arg0, %c0_i32 : i32, i32
  }
  func.func @transform_1(%arg0: i32, %arg1: i32) -> (i32, i32) {
    %c0_i32 = arith.constant 0 : i32
    %c0_i32_0 = arith.constant 0 : i32
    return %arg1, %c0_i32 : i32, i32
  }
  func.func @transform_2(%arg0: i32, %arg1: i32) -> (i32, i32) {
    %c0_i32 = arith.constant 0 : i32
    %c0_i32_0 = arith.constant 0 : i32
    return %arg0, %c0_i32 : i32, i32
  }
}

</mosaic_0001>

<bundles_post_ra>
// kernel: tpu_custom_call.1
= control target key start
LH: loop header
LB: loop body
LE: loop exit
PB: predicated region body
PF: predicated region fallthrough
CT: control target
= control target key end

     0   :  { %7 = vsyncpa [#allocation4], 0  ;;  %s435_s0 = inlined_call_operand.hbm [shape: s32[8,8], index: 0, kind: input, shape index: {}]   ;;  %s436_s1 = inlined_call_operand.hbm [shape: bf16[128,128], index: 1, kind: input, shape index: {}]   ;;  %s437_s2 = inlined_call_operand.hbm [shape: f32[8,128], index: 2, kind: output, shape index: {}]  }
   0x1   :  { %8 = vsyncpa [#allocation7], 0 }
   0x2   :  { %9 = vsyncpa [#allocation5], 0  ;;  %s379_s9 = smov [#allocation3]   ;;  %s380_s11 = smov [#allocation6]  }
   0x3   :  { %s16_s10 = sshll.u32 %s379_s9, 4  ;;  %s25_s12 = sshll.u32 %s380_s11, 4  ;;  %s17_s10 = int_to_ptr.vmem [resolvable:$true] %s16_s10  ;;  %s26_s12 = int_to_ptr.vmem [resolvable:$true] %s25_s12 }
   0x4   :  { %s321_s13 = scalar_lea.vmem %s17_s10, 128  ;;  %p326_p1 = scmp.lt.s32.totalorder %s17_s10, %s17_s10 }
   0x5   :  { %p322_p0 = scmp.ne.s32.totalorder %s17_s10, %s321_s13  ;;  %p327_p2 = scmp.lt.s32.totalorder %s321_s13, %s321_s13 }
   0x7   :  { %p328_p3 = por %p327_p2, %p326_p1 }
   0x9   :  { %p329_p4 = pnand %p328_p3, %p322_p0 }
   0xb   :  { %332 = shalt.err (!%p329_p4)
}
   0xc   :  { %19 = dma.hbm_to_vmem [thread:$0]  %s435_s0, 128, %s17_s10, [#allocation4]  }
   0xd   :  { %s341_s16 = scalar_lea.vmem %s26_s12, 1024  ;;  %p346_p6 = scmp.lt.s32.totalorder %s26_s12, %s26_s12 }
   0xe   :  { %p342_p5 = scmp.ne.s32.totalorder %s26_s12, %s341_s16  ;;  %p347_p7 = scmp.lt.s32.totalorder %s341_s16, %s341_s16 }
  0x10   :  { %p348_p8 = por %p347_p7, %p346_p6 }
  0x12   :  { %p349_p9 = pnand %p348_p8, %p342_p5 }
  0x14   :  { %352 = shalt.err (!%p349_p9)
}
  0x15   :  { %s381_s17 = smov 64   ;;  %s382_s18 = smov 4  }
  0x16   :  { %31 = dma.hbm_to_vmem [thread:$0]  %s436_s1, 1024, %s26_s12, [#allocation7], %s381_s17, %s381_s17, %s382_s18  }
  0x17   :  { %373 = dma.done.wait [#allocation4], 128  }
  0x18   :  { %374 = vsyncadd [#allocation4], 4294967168 }
  0x19   :  { %375 = dma.done.wait [#allocation7], 1024  }
  0x1a   :  { %376 = vsyncadd [#allocation7], 4294966272  ;;  %v383_v0 = vmov 2   ;;  %v384_v1 = vmov 0   ;;  %v385_v2 = vmov 0.0   ;;  %v49_v3 = vld [vmem:[#allocation3] sm:$0xff]  ;;  %v44_v18 = vlaneseq }
  0x1b   :  { %298 = vset.pattern.permute.xlu1 %v383_v0  ;;  %296 = vset.pattern.permute.xlu0 %v384_v1  ;;  %v305_v4 = vld [vmem:[#allocation6 + $0x38] sm:$0xff]   ;;  %v306_v5 = vld [vmem:[#allocation6 + $0x30] sm:$0xff]   ;;  %v386_v6 = vmov 3   ;;  %v387_v7 = vmov 1   ;;  %v307_v8 = vld [vmem:[#allocation6 + $0x28] sm:$0xff]   ;;  %v388_v9 = vmov 4  }
  0x1c   :  { %261 = vmatprep.subr.bf16.mxu0 %v385_v2  ;;  %65 = vperm.xlu1 %298, %v49_v3   ;;  %v389_v10 = vmov 5   ;;  %v308_v11 = vld [vmem:[#allocation6 + $0x20] sm:$0xff]   ;;  %v390_v12 = vmov 6   ;;  %v391_v13 = vmov 7   ;;  %v309_v14 = vld [vmem:[#allocation6 + $0x18] sm:$0xff]   ;;  %v310_v15 = vld [vmem:[#allocation6 + $0x10] sm:$0xff]  }
  0x1d   :  { %51 = vperm.xlu0 %296, %v49_v3   ;;  %262 = vmatpush3.bf16.msra.mxu0 %v305_v4  ;;  %vm392_vm0 = vmmov 0   ;;  %v311_v16 = vld [vmem:[#allocation6 + $0x8] sm:$0xff]   ;;  %v312_v17 = vld [vmem:[#allocation6] sm:$0xff]   ;;  %v45_v21 = vand.u32 127, %v44_v18  ;;  %s393_s0 = smov [#allocation8]  }
  0x1e   :  { %263 = vmatprep.subr.bf16.mxu0 %v385_v2  ;;  %277 = vmatprep.mubr.msk.bf16.mxu0 %vm392_vm0, %v385_v2  ;;  %s226_s1 = sshll.u32 %s393_s0, 4  ;;  %s227_s1 = int_to_ptr.vmem [resolvable:$true] %s226_s1 }
  0x1f   :  { %s353_s21 = scalar_lea.vmem %s227_s1, 128  ;;  %p358_p11 = scmp.lt.s32.totalorder %s227_s1, %s227_s1 }
  0x20   :  { %299 = vset.pattern.permute.xlu1 %v386_v6  ;;  %p354_p10 = scmp.ne.s32.totalorder %s227_s1, %s353_s21  ;;  %p359_p12 = scmp.lt.s32.totalorder %s353_s21, %s353_s21 }
  0x21   :  { %297 = vset.pattern.permute.xlu0 %v387_v7  ;;  %72 = vperm.xlu1 %299, %v49_v3  }
  0x22   :  { %58 = vperm.xlu0 %297, %v49_v3   ;;  %264 = vmatpush3.bf16.msra.mxu0 %v306_v5  ;;  %p360_p13 = por %p359_p12, %p358_p11 }
  0x23   :  { %265 = vmatprep.subr.bf16.mxu0 %v385_v2 }
  0x24   :  { %p361_p0 = pnand %p360_p13, %p354_p10 }
  0x25   :  { %300 = vset.pattern.permute.xlu1 %v388_v9 }
  0x26   :  { %301 = vset.pattern.permute.xlu0 %v389_v10  ;;  %79 = vperm.xlu1 %300, %v49_v3  }
  0x27   :  { %86 = vperm.xlu0 %301, %v49_v3   ;;  %266 = vmatpush3.bf16.msra.mxu0 %v307_v8 }
  0x28   :  { %267 = vmatprep.subr.bf16.mxu0 %v385_v2 }
  0x2a   :  { %302 = vset.pattern.permute.xlu1 %v390_v12 }
  0x2b   :  { %304 = vset.pattern.permute.xlu0 %v391_v13  ;;  %93 = vperm.xlu1 %302, %v49_v3  }
  0x2c   :  { %268 = vmatpush3.bf16.msra.mxu0 %v308_v11 }
  0x2d   :  { %269 = vmatprep.subr.bf16.mxu0 %v385_v2 }
  0x2f   :  { %303 = vset.pattern.permute.xlu1 %v391_v13 }
  0x30   :  { %270 = vmatpush3.bf16.msra.mxu0 %v309_v14  ;;  %100 = vperm.xlu1 %303, %v49_v3  }
  0x31   :  { %271 = vmatprep.subr.bf16.mxu0 %v385_v2 }
  0x34   :  { %272 = vmatpush3.bf16.msra.mxu0 %v310_v15 }
  0x35   :  { %273 = vmatprep.subr.bf16.mxu0 %v385_v2 }
  0x38   :  { %274 = vmatpush3.bf16.msra.mxu0 %v311_v16 }
  0x39   :  { %275 = vmatprep.subr.bf16.mxu0 %v385_v2 }
  0x3c   :  { %276 = vmatpush3.bf16.msra.mxu0 %v312_v17 }
  0x97   :  { %v66_v19 = vpop.permute.xlu1 %65 }
  0x98   :  { %v52_v20 = vpop.permute.xlu0 %51  ;;  %vm67_vm2 = vcmp.eq.s32.totalorder %v66_v19, %v45_v21 }
  0x99   :  { %vm53_vm1 = vcmp.eq.s32.totalorder %v52_v20, %v45_v21  ;;  %v238_v27 = vsel %vm67_vm2, 1.0, %v385_v2 }
  0x9a   :  { %v236_v24 = vsel %vm53_vm1, 1.0, %v385_v2 }
  0x9c   :  { %v73_v22 = vpop.permute.xlu1 %72 }
  0x9d   :  { %v59_v23 = vpop.permute.xlu0 %58  ;;  %vm74_vm4 = vcmp.eq.s32.totalorder %v73_v22, %v45_v21 }
  0x9e   :  { %vm60_vm3 = vcmp.eq.s32.totalorder %v59_v23, %v45_v21  ;;  %v239_v31 = vsel %vm74_vm4, 1.0, %v385_v2 }
  0x9f   :  { %v237_v25 = vsel %vm60_vm3, 1.0, %v385_v2 }
  0xa0   :  { %v63_v26 = vadd.f32 %v237_v25, %v236_v24 }
  0xa1   :  { %v80_v29 = vpop.permute.xlu1 %79 }
  0xa2   :  { %v70_v28 = vadd.f32 %v238_v27, %v63_v26  ;;  %v87_v30 = vpop.permute.xlu0 %86  ;;  %vm81_vm5 = vcmp.eq.s32.totalorder %v80_v29, %v45_v21 }
  0xa3   :  { %vm88_vm6 = vcmp.eq.s32.totalorder %v87_v30, %v45_v21  ;;  %v240_v33 = vsel %vm81_vm5, 1.0, %v385_v2 }
  0xa4   :  { %v77_v32 = vadd.f32 %v239_v31, %v70_v28  ;;  %v241_v35 = vsel %vm88_vm6, 1.0, %v385_v2 }
  0xa6   :  { %v84_v34 = vadd.f32 %v240_v33, %v77_v32  ;;  %v94_v36 = vpop.permute.xlu1 %93 }
  0xa7   :  { %vm95_vm7 = vcmp.eq.s32.totalorder %v94_v36, %v45_v21 }
  0xa8   :  { %v91_v37 = vadd.f32 %v241_v35, %v84_v34  ;;  %v242_v38 = vsel %vm95_vm7, 1.0, %v385_v2 }
  0xaa   :  { %v98_v40 = vadd.f32 %v242_v38, %v91_v37 }
  0xab   :  { %v101_v39 = vpop.permute.xlu1 %100 }
  0xac   :  { %vm102_vm8 = vcmp.eq.s32.totalorder %v101_v39, %v45_v21 }
  0xad   :  { %v243_v41 = vsel %vm102_vm8, 1.0, %v385_v2 }
  0xae   :  { %v105_v42 = vadd.f32 %v243_v41, %v98_v40 }
  0xb0   :  { %v107_v43 = vpack.c.bf16 %v105_v42, %v105_v42 }
  0xb2   :  { %278 = vmatmul.mubr.bf16.vlgmr.msra.gmra.mxu0 %v107_v43 }
 0x172   :  { %v206_v44 = vpop.f32.mrf.mxu0 }
 0x173   :  { %v218_v45 = vmul.f32 0.125, %v206_v44 }
 0x174   :  { %v279_v46 = vpop.f32.mrf.mxu0 }
 0x175   :  { %219 = vst [vmem:[#allocation8] sm:$0xff] %v218_v45 }
 0x176   :  { %v209_v47 = vpop.f32.mrf.mxu0 }
 0x177   :  { %364 = shalt.err (!%p361_p0)
}
 0x178   :  { %229 = dma.vmem_to_hbm [thread:$0]  %s227_s1, 128, %s437_s2, [#allocation5]   ;;  %v280_v48 = vpop.f32.mrf.mxu0 }
 0x179   :  { %377 = dma.done.wait [#allocation5], 128  }
 0x17a   :  { %378 = vsyncadd [#allocation5], 4294967168 }
 0x17b   :  { %233 = vsyncpa [#allocation4], 1 }
 0x17c   :  { %234 = vsyncpa [#allocation7], 1 }
 0x17d   :  { %235 = vsyncpa [#allocation5], 1 }

</bundles_post_ra>
